<compile_context>
chip_gen: v7x
topology: tpu7x:2x2x1
jax: 0.10.0
libtpu: 0.0.40
codegen_flags: <defaults>
</compile_context>

<pallas_src>
from functools import partial

import jax
import jax.numpy as jnp
from jax.experimental import pallas as pl
from jax.experimental.pallas import tpu as pltpu


def ae_kernel(*refs, logistic: bool, use_dropout: bool):
    if use_dropout:
        x_ref, wt_ref, w_ref, mask_ref, dec_ref, enc_ref = refs
    else:
        x_ref, wt_ref, w_ref, dec_ref, enc_ref = refs

    x = x_ref[...]            # (TB, D) bf16
    wt = wt_ref[...]          # (D, H)  bf16  (pre-transposed fc1.weight)

    # encoded = relu(x @ W.T): bf16 MXU matmul, f32 accumulation, no in-kernel transpose.
    enc = jnp.dot(x, wt, preferred_element_type=jnp.float32)     # (TB, H) f32
    enc = jnp.maximum(enc, 0.0)                                  # VPU, f32
    enc_ref[...] = enc        # "encoded" output is pre-dropout (as in the PyTorch module)

    h = enc
    if use_dropout:
        # mask already carries the 1/(1-p) survivor scaling (0 for dropped units).
        h = h * mask_ref[...]

    # decoded = h @ W: W is (H, D), contraction on its sublane dim -> MXU-direct.
    dec = jnp.dot(h.astype(jnp.bfloat16), w_ref[...],
                  preferred_element_type=jnp.float32)            # (TB, D) f32
    if logistic:
        dec = jax.nn.sigmoid(dec)                                # EUP, f32
    dec_ref[...] = dec


def autoencoder_forward(x, w, *, dropout_rate=0.5, training=False, logistic=True,
                        dropout_key=None, tile_b=None):
    """x: (B, C, H, W) or (B, D) float; w: tied weight, shape (hidden, input)."""
    B = x.shape[0]
    xf = x.reshape(B, -1)
    D = xf.shape[1]
    H = w.shape[0]
    assert w.shape == (H, D)
    # Keep lane dims 128-aligned (pad in the wrapper when scaling to e.g. D=784).
    assert D % 128 == 0 and H % 128 == 0, "pad D / hidden to multiples of 128"

    # bf16 matmul operands (MXU-native, halves weight/input DMA bytes).
    xb = xf.astype(jnp.bfloat16)
    wb = w.astype(jnp.bfloat16)      # (H, D) — decoder matmul (h @ W)
    wtb = wb.T                       # (D, H) — encoder matmul, transposed ONCE here

    # Batch tiling: fill the MXU M-dimension and pipeline x/dec DMAs behind compute.
    if tile_b is None:
        tile_b = min(B, 256)
    tile_b = max(8, min(tile_b, B if B >= 8 else 8))
    pad = (-B) % tile_b
    if pad:
        xb = jnp.pad(xb, ((0, pad), (0, 0)))
    Bp = B + pad
    grid = (Bp // tile_b,)

    use_dropout = bool(training) and float(dropout_rate) > 0.0

    in_specs = [
        pl.BlockSpec((tile_b, D), lambda b: (b, 0)),   # x tile
        pl.BlockSpec((D, H), lambda b: (0, 0)),        # W.T resident across grid
        pl.BlockSpec((H, D), lambda b: (0, 0)),        # W   resident across grid
    ]
    inputs = [xb, wtb, wb]
    bytes_accessed = xb.size * 2 + wtb.size * 2 + wb.size * 2 + Bp * D * 4 + Bp * H * 4

    if use_dropout:
        if dropout_key is None:
            dropout_key = jax.random.PRNGKey(0)
        keep_p = 1.0 - float(dropout_rate)
        keep = jax.random.bernoulli(dropout_key, keep_p, (Bp, H))
        mask = keep.astype(jnp.float32) * (1.0 / keep_p)
        in_specs.append(pl.BlockSpec((tile_b, H), lambda b: (b, 0)))
        inputs.append(mask)
        bytes_accessed += mask.size * 4

    out_specs = (pl.BlockSpec((tile_b, D), lambda b: (b, 0)),   # decoded
                 pl.BlockSpec((tile_b, H), lambda b: (b, 0)))   # encoded
    out_shapes = (jax.ShapeDtypeStruct((Bp, D), jnp.float32),
                  jax.ShapeDtypeStruct((Bp, H), jnp.float32))

    cost = pl.CostEstimate(
        flops=4 * Bp * D * H,                                  # two matmuls
        transcendentals=Bp * D if logistic else 0,             # sigmoid
        bytes_accessed=int(bytes_accessed))

    kernel = partial(ae_kernel, logistic=bool(logistic), use_dropout=use_dropout)

    dec, enc = pl.pallas_call(
        kernel,
        out_shape=out_shapes,
        grid=grid,
        in_specs=in_specs,
        out_specs=out_specs,
        compiler_params=pltpu.CompilerParams(
            dimension_semantics=("parallel",)),   # batch axis -> both TCs on v7x
        cost_estimate=cost,
    )(*inputs)

    if pad:
        dec = dec[:B]
        enc = enc[:B]
    return dec, enc


if __name__ == "__main__":
    # Small shapes consistent with the module: x.view(B, -1) -> D = C*H*W.
    B, C, Hs, Ws = 32, 1, 16, 16          # D = 256
    D = C * Hs * Ws
    HID = 128                             # hidden_size

    key = jax.random.PRNGKey(0)
    kx, kw, kd = jax.random.split(key, 3)
    x = jax.random.normal(kx, (B, C, Hs, Ws), dtype=jnp.float32)
    # Tied weight: last init (std = 1/sqrt(hidden)) wins for the shared storage.
    w = jax.random.normal(kw, (HID, D), dtype=jnp.float32) / jnp.sqrt(
        jnp.asarray(HID, jnp.float32))

    # ---- eval mode (dropout = identity) ----
    dec, enc = autoencoder_forward(x, w, dropout_rate=0.5, training=False,
                                   logistic=True, tile_b=16)
    jax.block_until_ready((dec, enc))

    # Reference mirroring the MXU math: bf16-quantized operands, f32 accumulation.
    xf = x.reshape(B, -1)
    xr = xf.astype(jnp.bfloat16).astype(jnp.float32)
    wr = w.astype(jnp.bfloat16).astype(jnp.float32)
    enc_ref = jnp.maximum(
        jnp.dot(xr, wr.T, precision=jax.lax.Precision.HIGHEST), 0.0)
    hr = enc_ref.astype(jnp.bfloat16).astype(jnp.float32)
    dec_ref = jax.nn.sigmoid(jnp.dot(hr, wr, precision=jax.lax.Precision.HIGHEST))
    assert jnp.allclose(enc, enc_ref, atol=1e-3, rtol=1e-3), "encoded mismatch"
    assert jnp.allclose(dec, dec_ref, atol=1e-3, rtol=1e-3), "decoded mismatch"

    # ---- train mode (dropout mask from jax.random, applied inside the kernel) ----
    dec_t, enc_t = autoencoder_forward(x, w, dropout_rate=0.5, training=True,
                                       logistic=True, dropout_key=kd, tile_b=16)
    jax.block_until_ready((dec_t, enc_t))
    assert dec_t.shape == (B, D) and enc_t.shape == (B, HID)
    # encoded output is pre-dropout, so it matches eval mode exactly.
    assert jnp.allclose(enc_t, enc_ref, atol=1e-3, rtol=1e-3)
    assert bool(jnp.all(jnp.isfinite(dec_t)))

    print("KERNEL_OK")
</pallas_src>

<mosaic_0001>
module attributes {stable_mosaic.version = 11 : i64} {
  func.func @ae_kernel(%arg0: i32, %arg1: memref<16x256xbf16, #tpu.memory_space<vmem>>, %arg2: memref<256x128xbf16, #tpu.memory_space<vmem>>, %arg3: memref<128x256xbf16, #tpu.memory_space<vmem>>, %arg4: memref<16x256xf32, #tpu.memory_space<vmem>>, %arg5: memref<16x128xf32, #tpu.memory_space<vmem>>) attributes {dimension_semantics = [#tpu.dimension_semantics<parallel>], iteration_bounds = array<i64: 2>, scalar_prefetch = 0 : i64, scratch_operands = 0 : i64, tpu.core_type = #tpu.core_type<tc>, window_params = [{transform_indices = @transform_0, window_bounds = array<i64: 16, 256>}, {pipeline_mode = #tpu.pipeline_mode<synchronous>, transform_indices = @transform_1, window_bounds = array<i64: 256, 128>}, {pipeline_mode = #tpu.pipeline_mode<synchronous>, transform_indices = @transform_2, window_bounds = array<i64: 128, 256>}, {transform_indices = @transform_3, window_bounds = array<i64: 16, 256>}, {transform_indices = @transform_4, window_bounds = array<i64: 16, 128>}]} {
    %c0 = arith.constant 0 : index
    %c0_0 = arith.constant 0 : index
    %0 = vector.load %arg1[%c0, %c0_0] : memref<16x256xbf16, #tpu.memory_space<vmem>>, vector<16x256xbf16>
    %c0_1 = arith.constant 0 : index
    %c0_2 = arith.constant 0 : index
    %1 = vector.load %arg2[%c0_1, %c0_2] : memref<256x128xbf16, #tpu.memory_space<vmem>>, vector<256x128xbf16>
    %cst = arith.constant dense<0.000000e+00> : vector<16x128xf32>
    %2 = tpu.matmul %0, %1, %cst {dimension_numbers = #tpu.dot_dimension_numbers<[1], [0], [0], [1], [0, 0, 1, 1], [], []>} : vector<16x256xbf16>, vector<256x128xbf16>, vector<16x128xf32> -> vector<16x128xf32>
    %cst_3 = arith.constant 0.000000e+00 : f32
    %3 = vector.broadcast %cst_3 : f32 to vector<16x128xf32>
    %4 = arith.maximumf %2, %3 : vector<16x128xf32>
    %c0_4 = arith.constant 0 : index
    %c0_5 = arith.constant 0 : index
    %5 = vector.load %arg5[%c0_4, %c0_5] : memref<16x128xf32, #tpu.memory_space<vmem>>, vector<16x128xf32>
    tpu.vector_store %arg5[%c0_4, %c0_5], %4 {strides = array<i32>} : memref<16x128xf32, #tpu.memory_space<vmem>>, vector<16x128xf32>,
    %6 = arith.truncf %4 : vector<16x128xf32> to vector<16x128xbf16>
    %c0_6 = arith.constant 0 : index
    %c0_7 = arith.constant 0 : index
    %7 = vector.load %arg3[%c0_6, %c0_7] : memref<128x256xbf16, #tpu.memory_space<vmem>>, vector<128x256xbf16>
    %cst_8 = arith.constant dense<0.000000e+00> : vector<16x256xf32>
    %8 = tpu.matmul %6, %7, %cst_8 {dimension_numbers = #tpu.dot_dimension_numbers<[1], [0], [0], [1], [0, 0, 1, 1], [], []>} : vector<16x128xbf16>, vector<128x256xbf16>, vector<16x256xf32> -> vector<16x256xf32>
    %9 = arith.negf %8 : vector<16x256xf32>
    %10 = math.exp %9 : vector<16x256xf32>
    %cst_9 = arith.constant 1.000000e+00 : f32
    %11 = vector.broadcast %cst_9 : f32 to vector<16x256xf32>
    %12 = arith.addf %11, %10 : vector<16x256xf32>
    %13 = arith.divf %11, %12 : vector<16x256xf32>
    %c0_10 = arith.constant 0 : index
    %c0_11 = arith.constant 0 : index
    %14 = vector.load %arg4[%c0_10, %c0_11] : memref<16x256xf32, #tpu.memory_space<vmem>>, vector<16x256xf32>
    tpu.vector_store %arg4[%c0_10, %c0_11], %13 {strides = array<i32>} : memref<16x256xf32, #tpu.memory_space<vmem>>, vector<16x256xf32>,
    return
  }
  func.func @transform_0(%arg0: i32) -> (i32, i32) {
    %c0_i32 = arith.constant 0 : i32
    %c0_i32_0 = arith.constant 0 : i32
    return %arg0, %c0_i32 : i32, i32
  }
  func.func @transform_1(%arg0: i32) -> (i32, i32) {
    %c0_i32 = arith.constant 0 : i32
    %c0_i32_0 = arith.constant 0 : i32
    %c0_i32_1 = arith.constant 0 : i32
    return %c0_i32, %c0_i32_0 : i32, i32
  }
  func.func @transform_2(%arg0: i32) -> (i32, i32) {
    %c0_i32 = arith.constant 0 : i32
    %c0_i32_0 = arith.constant 0 : i32
    %c0_i32_1 = arith.constant 0 : i32
    return %c0_i32, %c0_i32_0 : i32, i32
  }
  func.func @transform_3(%arg0: i32) -> (i32, i32) {
    %c0_i32 = arith.constant 0 : i32
    %c0_i32_0 = arith.constant 0 : i32
    return %arg0, %c0_i32 : i32, i32
  }
  func.func @transform_4(%arg0: i32) -> (i32, i32) {
    %c0_i32 = arith.constant 0 : i32
    %c0_i32_0 = arith.constant 0 : i32
    return %arg0, %c0_i32 : i32, i32
  }
}

</mosaic_0001>

<bundles_post_ra>
// kernel: tpu_custom_call.1
= control target key start
LH: loop header
LB: loop body
LE: loop exit
PB: predicated region body
PF: predicated region fallthrough
CT: control target
= control target key end

     0   :  { %10 = vsyncpa [#allocation3], 0  ;;  %s1513_s0 = inlined_call_operand.hbm [shape: bf16[32,256], index: 0, kind: input, shape index: {}]   ;;  %s1514_s1 = inlined_call_operand.hbm [shape: bf16[256,128], index: 1, kind: input, shape index: {}]   ;;  %s1515_s2 = inlined_call_operand.hbm [shape: bf16[128,256], index: 2, kind: input, shape index: {}]   ;;  %s1516_s3 = inlined_call_operand.hbm [shape: f32[32,256], index: 3, kind: output, shape index: {0}]   ;;  %s1517_s4 = inlined_call_operand.hbm [shape: f32[32,128], index: 4, kind: output, shape index: {1}]  }
   0x1   :  { %12 = vsyncpa [#allocation3 + $0x1], 0 }
   0x2   :  { %13 = vsyncpa [#allocation6], 0 }
   0x3   :  { %14 = vsyncpa [#allocation4], 0 }
   0x4   :  { %16 = vsyncpa [#allocation4 + $0x1], 0 }
   0x5   :  { %17 = vsyncpa [#allocation10], 0 }
   0x6   :  { %19 = vsyncpa [#allocation10 + $0x1], 0  ;;  %s1232_s15 = smov 0   ;;  %s1234_s16 = smov 0  }
   0x7   :  { %s1236_s17 = smov 0   ;;  %s1238_s18 = smov 0  }
   0x8 LB: > { %s1253_s19 = sadd.s32 4294967295, %s1191_s18   ;;  %s774_s20 = sadd.s32 4294967294, %s1191_s18   ;;  %s1191_s18 = sphi %s1238_s18, %s1537_s18   ;;  %s1187_s17 = sphi %s1236_s17, %s1536_s17   ;;  %s1183_s16 = sphi %s1234_s16, %s1535_s16   ;;  %s1179_s15 = sphi %s1232_s15, %s1534_s15  }
   0x9   : > { %p45_p0 = scmp.ne.s32.totalorder %s1183_s16, %s1179_s15  ;;  %p1518_p1 = scmp.eq.s32.totalorder %s1253_s19, 0 }
   0xa   : > { %p117_p3 = scmp.eq.s32.totalorder %s774_s20, 1  ;;  %p775_p5 = scmp.ge.s32.totalorder %s1191_s18, 1 }
   0xb   : > { %p1262_p4 = por %p1518_p1, %p45_p0  ;;  %p150_p7 = scmp.lt.s32.totalorder %s1191_s18, 3 }
   0xc   : > { %p1267_p6 = por %p117_p3, %p45_p0  ;;  %s1193_s24 = smov [#allocation5]  }
   0xd   : > { %s1521_s21 = scalar_select %p1262_p4, 1, 0 }
   0xe   : > { %s1522_s22 = scalar_select %p1267_p6, 1, 0 }
   0xf   : > { %p1272_p8 = pnand %p775_p5, %p150_p7  ;;  %s162_s25 = sshll.u32 %s1193_s24, 4  ;;  %s1276_s25 = int_to_ptr.vmem [resolvable:$true] %s162_s25 }
  0x10   : > { %s1194_s27 = smov [#allocation7]   ;;  %s1003_s5 = scalar_lea.hbm %s1514_s1, 2048 }
  0x11   : > { %p877_p9 = pneg %p1272_p8  ;;  %s175_s28 = sshll.u32 %s1194_s27, 4  ;;  %s1287_s28 = int_to_ptr.vmem [resolvable:$true] %s175_s28 }
  0x12   : > { %p1004_p12 = scmp.ne.s32.totalorder %s1514_s1, %s1003_s5  ;;  %p1010_p5 = scmp.lt.u32.totalorder %s1003_s5, %s1514_s1 }
  0x13   : > { %p1283_p11 = pnand %p877_p9, %p1518_p1 }
  0x15   : > { %p1005_p13 = pneg %p1283_p11 }
  0x17   : > { %p1006_p0 = pnand %p1005_p13, %p1004_p12 }
  0x19   : > { %p1007_p3 = pneg %p1006_p0 }
  0x1b   : > { %p1012_p7 = pnand %p1010_p5, %p1007_p3 }
  0x1d   : > { %1015 = shalt.err (!%p1012_p7)
}
  0x1e   : > { %s1016_s10 = scalar_lea.vmem %s1276_s25, 2048  ;;  %p1024_p2 = scmp.lt.s32.totalorder %s1276_s25, %s1276_s25 }
  0x1f   : > { %p1017_p9 = scmp.ne.s32.totalorder %s1276_s25, %s1016_s10  ;;  %p1025_p12 = scmp.lt.s32.totalorder %s1016_s10, %s1016_s10 }
  0x21   : > { %p1019_p10 = pnand %p1017_p9, %p1005_p13  ;;  %p1026_p0 = por %p1025_p12, %p1024_p2 }
  0x23   : > { %p1020_p1 = pneg %p1019_p10 }
  0x25   : > { %p1027_p6 = pnand %p1026_p0, %p1020_p1 }
  0x27   : > { %1030 = shalt.err (!%p1027_p6)
}
  0x28   : > { %s1195_s11 = smov 64   ;;  %s1196_s12 = smov 4  }
  0x29   : > { %880 = dma.hbm_to_vmem [thread:$0]  (!%p1283_p11), %s1514_s1, 2048, %s1276_s25, [#allocation6], %s1195_s11, %s1195_s11, %s1196_s12  }
  0x2a   : > { %s1031_s27 = scalar_lea.hbm %s1515_s2, 2048 }
  0x2b   : > { %p1032_p2 = scmp.ne.s32.totalorder %s1515_s2, %s1031_s27  ;;  %p1038_p10 = scmp.lt.u32.totalorder %s1031_s27, %s1515_s2 }
  0x2d   : > { %p1034_p1 = pnand %p1032_p2, %p1005_p13 }
  0x2f   : > { %p1035_p6 = pneg %p1034_p1 }
  0x31   : > { %p1040_p3 = pnand %p1038_p10, %p1035_p6 }
  0x33   : > { %1043 = shalt.err (!%p1040_p3)
}
  0x34   : > { %s1044_s25 = scalar_lea.vmem %s1287_s28, 2048  ;;  %p1052_p12 = scmp.lt.s32.totalorder %s1287_s28, %s1287_s28 }
  0x35   : > { %p1045_p5 = scmp.ne.s32.totalorder %s1287_s28, %s1044_s25  ;;  %p1053_p0 = scmp.lt.s32.totalorder %s1044_s25, %s1044_s25 }
  0x37   : > { %p1047_p7 = pnand %p1045_p5, %p1005_p13  ;;  %p1054_p2 = por %p1053_p0, %p1052_p12 }
  0x39   : > { %p1048_p9 = pneg %p1047_p7 }
  0x3b   : > { %p1055_p1 = pnand %p1054_p2, %p1048_p9 }
  0x3d   : > { %1058 = shalt.err (!%p1055_p1)
}
  0x3e   : > { %s1197_s7 = smov 128   ;;  %s1198_s8 = smov 8  }
  0x3f   : > { %883 = dma.hbm_to_vmem [thread:$0]  (!%p1283_p11), %s1515_s2, 2048, %s1287_s28, [#allocation6], %s1197_s7, %s1197_s7, %s1198_s8  }
  0x40   : > { %s1345_s11 = sadd.s32 1, %s1191_s18   ;;  %s32_s13 = sadd.s32 1, %s1187_s17 }
  0x41   : > { %s29_s12 = ssub.s32 %s1191_s18, %s1345_s11  ;;  %p39_p6 = scmp.ne.s32.totalorder %s1187_s17, %s1183_s16 }
  0x42   : > { %p30_p13 = scmp.eq.s32.totalorder %s29_s12, 0  ;;  %p40_p10 = scmp.eq.s32.totalorder %s1191_s18, 0 }
  0x43   : > { %p1525_p5 = scmp.eq.s32.totalorder %s1253_s19, 1  ;;  %p897_p9 = scmp.lt.s32.totalorder %s1191_s18, 2 }
  0x44   : > { %s1354_s14 = scalar_select %p30_p13, %s1187_s17, %s32_s13  }
  0x45   : > { %p41_p3 = por %p40_p10, %p39_p6  ;;  %p1358_p7 = por %p1525_p5, %p39_p6 }
  0x46   : > { %s189_s20 = sand.u32 1, %s1187_s17   ;;  %s837_s28 = sshll.u32 %s1191_s18, 8 }
  0x47   : > { %s1526_s26 = scalar_select %p1358_p7, 1, 0 }
  0x48   : > { %s779_s24 = sshll.u32 %s189_s20, 4  ;;  %s1368_s30 = scalar_lea.hbm %s1513_s0, %s837_s28 }
  0x49   : > { %s193_s5 = scalar_lea.vmem [#allocation2], %s779_s24  ;;  %p1372_p11 = pnand %p897_p9, %p41_p3 }
  0x4a   : > { %s201_s6 = sshll.u32 %s193_s5, 4  ;;  %s1376_s9 = scalar_lea.sflag [#allocation3], %s189_s20  ;;  %s1370_s6 = int_to_ptr.vmem [resolvable:$true] %s201_s6 }
  0x4b   : > { %s1059_s10 = scalar_lea.hbm %s1368_s30, 256  ;;  %p1061_p0 = pneg %p1372_p11 }
  0x4c   : > { %p1060_p12 = scmp.ne.s32.totalorder %s1368_s30, %s1059_s10  ;;  %s1064_s24 = scalar_lea.hbm %s1513_s0, 512 }
  0x4d   : > { %p1065_p13 = scmp.lt.u32.totalorder %s1368_s30, %s1513_s0  ;;  %p1066_p6 = scmp.lt.u32.totalorder %s1064_s24, %s1059_s10 }
  0x4e   : > { %p1062_p2 = pnand %p1061_p0, %p1060_p12  ;;  %p1068_p3 = scmp.lt.u32.totalorder %s1059_s10, %s1368_s30 }
  0x4f   : > { %p1067_p10 = por %p1066_p6, %p1065_p13 }
  0x50   : > { %p1063_p1 = pneg %p1062_p2 }
  0x51   : > { %p1069_p5 = por %p1068_p3, %p1067_p10 }
  0x53   : > { %p1070_p9 = pnand %p1069_p5, %p1063_p1 }
  0x55   : > { %1073 = shalt.err (!%p1070_p9)
}
  0x56   : > { %s1074_s20 = scalar_lea.vmem %s1370_s6, 256  ;;  %s1199_s29 = smov [#allocation2]  }
  0x57   : > { %p1075_p12 = scmp.ne.s32.totalorder %s1370_s6, %s1074_s20  ;;  %s1079_s5 = sshll.u32 %s1199_s29, 4  ;;  %s1080_s5 = int_to_ptr.vmem [resolvable:$false] %s1079_s5 }
  0x58   : > { %s1081_s12 = scalar_lea.vmem %s1080_s5, 512  ;;  %p1082_p4 = scmp.lt.s32.totalorder %s1370_s6, %s1080_s5 }
  0x59   : > { %p1077_p2 = pnand %p1075_p12, %p1061_p0  ;;  %p1083_p13 = scmp.lt.s32.totalorder %s1081_s12, %s1074_s20 }
  0x5b   : > { %p1078_p7 = pneg %p1077_p2  ;;  %p1084_p6 = por %p1083_p13, %p1082_p4 }
  0x5d   : > { %p1085_p10 = pnand %p1084_p6, %p1078_p7 }
  0x5f   : > { %1088 = shalt.err (!%p1085_p10)
}
  0x60   : > { %887 = dma.hbm_to_vmem [thread:$0]  (!%p1372_p11), %s1368_s30, 256, %s1370_s6, %s1376_s9, %s1197_s7, %s1197_s7, %s1198_s8  }
  0x61   : > { %213 = sbr.rel (%p1272_p8) target bundleno = 618 (0x26a), region = 32  ;;  %s1410_s10 = sand.u32 (!%p1272_p8), 1, %s1183_s16  }
  0x62   : > { %s784_s13 = sshll.u32 (!%p1272_p8), %s1410_s10, 4  ;;  %s216_s24 = scalar_lea.sflag (!%p1272_p8), [#allocation3], %s1410_s10 }
  0x63   : > { %s1416_s25 = scalar_lea.vmem (!%p1272_p8), [#allocation2], %s784_s13  ;;  %p1528_p4 = scmp.ne.s32.totalorder (!%p1272_p8), %s1521_s21, 0 }
  0x68   : > { %1162 = dma.done.wait (%p1528_p4), %s216_s24, 256  }
  0x69   : > { %1164 = vsyncadd (%p1528_p4), %s216_s24, 4294967040  ;;  %p1529_p7 = scmp.eq.s32.totalorder %s1253_s19, 0 }
  0x6b   : > { %1166 = dma.done.wait (%p1529_p7), [#allocation6], 4096   ;;  %p1530_p8 = pmov %p1529_p7 }
  0x6c   : > { %v944_v0 = vld [vmem:[#allocation5 + $0x40] sm:$0xff]   ;;  %v946_v2 = vld [vmem:[#allocation5 + $0x48] sm:$0xff]   ;;  %v948_v4 = vld [vmem:[#allocation5 + $0x50] sm:$0xff]   ;;  %v1200_v34 = vmov 0   ;;  %s256_s21 = scalar_lea.vmem [#allocation9], %s784_s13  ;;  %s840_s7 = sshll.u32 %s1253_s19, 8 }
  0x6d   : > { %1168 = vsyncadd (%p1530_p8), [#allocation6], 4294963200  ;;  %v945_v1 = vld [vmem:[#allocation5] sm:$0xff]   ;;  %841 = vmatprep.subr.bf16.mxu0 %v944_v0  ;;  %v947_v3 = vld [vmem:[#allocation5 + $0x8] sm:$0xff]   ;;  %575 = vmatprep.mubr.bf16.mxu1 %v1200_v34  ;;  %s650_s23 = sshll.u32 %s256_s21, 4  ;;  %s1436_s6 = scalar_lea.hbm %s1517_s4, %s840_s7  ;;  %s1430_s23 = int_to_ptr.vmem [resolvable:$true] %s650_s23 }
  0x6e   : > { %842 = vmatpush3.bf16.msra.mxu0 %v945_v1  ;;  %v949_v5 = vld [vmem:[#allocation5 + $0x10] sm:$0xff]   ;;  %v950_v6 = vld [vmem:[#allocation5 + $0x58] sm:$0xff]   ;;  %v952_v8 = vld [vmem:[#allocation5 + $0x60] sm:$0xff]   ;;  %s620_s9 = scalar_lea.sflag [#allocation10], %s1410_s10  ;;  %s1089_s28 = scalar_lea.vmem %s1430_s23, 256 }
  0x6f   : > { %843 = vmatprep.subr.bf16.mxu0 %v946_v2  ;;  %v951_v7 = vld [vmem:[#allocation5 + $0x18] sm:$0xff]   ;;  %v953_v9 = vld [vmem:[#allocation5 + $0x20] sm:$0xff]   ;;  %v954_v10 = vld [vmem:[#allocation5 + $0x68] sm:$0xff]   ;;  %p1090_p11 = scmp.ne.s32.totalorder %s1430_s23, %s1089_s28  ;;  %p1531_p0 = scmp.ne.s32.totalorder %s1526_s26, 0 }
  0x70   : > { %v962_v11 = vld [vmem:[%s1416_s25 + $0x4] ss:$8 sps:$4 sm:$0xff]   ;;  %v965_v13 = vld [vmem:[#allocation7] ss:$8 sps:$4 sm:$0xff]   ;;  %v968_v17 = vld [vmem:[#allocation7 + $0x10] ss:$8 sps:$4 sm:$0xff]  }
  0x71   : > { %v963_v12 = vld [vmem:[#allocation7 + $0x4] ss:$8 sps:$4 sm:$0xff]   ;;  %433 = vmatprep.mubr.bf16.mxu0 %v962_v11  ;;  %v966_v15 = vld [vmem:[#allocation7 + $0x14] ss:$8 sps:$4 sm:$0xff]   ;;  %v971_v21 = vld [vmem:[#allocation7 + $0x20] ss:$8 sps:$4 sm:$0xff]   ;;  %p1091_p1 = pnand %p1090_p11, %p1531_p0 }
  0x72   : > { %844 = vmatpush3.bf16.msra.mxu0 %v947_v3  ;;  %v955_v14 = vld [vmem:[#allocation5 + $0x28] sm:$0xff]   ;;  %v956_v16 = vld [vmem:[#allocation5 + $0x70] sm:$0xff]   ;;  %543 = vmatprep.subr.bf16.mxu1 %v963_v12  ;;  %v958_v20 = vld [vmem:[#allocation5 + $0x78] sm:$0xff]   ;;  %s1201_s27 = smov [#allocation9]  }
  0x73   : > { %845 = vmatprep.subr.bf16.mxu0 %v948_v4  ;;  %544 = vmatpush1.bf16.msra.mxu1 %v965_v13  ;;  %v969_v18 = vld [vmem:[#allocation7 + $0x24] ss:$8 sps:$4 sm:$0xff]   ;;  %v957_v19 = vld [vmem:[#allocation5 + $0x30] sm:$0xff]   ;;  %v959_v23 = vld [vmem:[#allocation5 + $0x38] sm:$0xff]   ;;  %p1092_p3 = pneg %p1091_p1  ;;  %s1093_s20 = sshll.u32 %s1201_s27, 4  ;;  %s1094_s20 = int_to_ptr.vmem [resolvable:$false] %s1093_s20 }
  0x74   : > { %545 = vmatprep.subr.bf16.mxu1 %v966_v15  ;;  %v972_v22 = vld [vmem:[#allocation7 + $0x34] ss:$8 sps:$4 sm:$0xff]   ;;  %v974_v24 = vld [vmem:[#allocation7 + $0x30] ss:$8 sps:$4 sm:$0xff]   ;;  %v975_v26 = vld [vmem:[#allocation7 + $0x44] ss:$8 sps:$4 sm:$0xff]   ;;  %p1096_p5 = scmp.lt.s32.totalorder %s1430_s23, %s1094_s20 }
  0x75   : > { %v960_v25 = vld [vmem:[%s1416_s25] ss:$8 sps:$4 sm:$0xff]   ;;  %v978_v28 = vld [vmem:[#allocation7 + $0x54] ss:$8 sps:$4 sm:$0xff]   ;;  %v981_v30 = vld [vmem:[#allocation7 + $0x64] ss:$8 sps:$4 sm:$0xff]  }
  0x76   : > { %846 = vmatpush3.bf16.msra.mxu0 %v949_v5  ;;  %v977_v27 = vld [vmem:[#allocation7 + $0x40] ss:$8 sps:$4 sm:$0xff]   ;;  %v980_v29 = vld [vmem:[#allocation7 + $0x50] ss:$8 sps:$4 sm:$0xff]   ;;  %v984_v32 = vld [vmem:[#allocation7 + $0x74] ss:$8 sps:$4 sm:$0xff]  }
  0x77   : > { %847 = vmatprep.subr.bf16.mxu0 %v950_v6  ;;  %546 = vmatpush1.bf16.msra.mxu1 %v968_v17  ;;  %v983_v31 = vld [vmem:[#allocation7 + $0x60] ss:$8 sps:$4 sm:$0xff]   ;;  %v986_v33 = vld [vmem:[#allocation7 + $0x70] ss:$8 sps:$4 sm:$0xff]   ;;  %s1095_s29 = scalar_lea.vmem %s1094_s20, 512 }
  0x78   : > { %547 = vmatprep.subr.bf16.mxu1 %v969_v18  ;;  %p1097_p9 = scmp.lt.s32.totalorder %s1095_s29, %s1089_s28 }
  0x7a   : > { %848 = vmatpush3.bf16.msra.mxu0 %v951_v7  ;;  %p1098_p12 = por %p1097_p9, %p1096_p5 }
  0x7b   : > { %849 = vmatprep.subr.bf16.mxu0 %v952_v8  ;;  %548 = vmatpush1.bf16.msra.mxu1 %v971_v21 }
  0x7c   : > { %549 = vmatprep.subr.bf16.mxu1 %v972_v22  ;;  %p1099_p2 = pnand %p1098_p12, %p1092_p3 }
  0x7e   : > { %850 = vmatpush3.bf16.msra.mxu0 %v953_v9 }
  0x7f   : > { %851 = vmatprep.subr.bf16.mxu0 %v954_v10  ;;  %550 = vmatpush1.bf16.msra.mxu1 %v974_v24 }
  0x80   : > { %551 = vmatprep.subr.bf16.mxu1 %v975_v26 }
  0x82   : > { %852 = vmatpush3.bf16.msra.mxu0 %v955_v14 }
  0x83   : > { %853 = vmatprep.subr.bf16.mxu0 %v956_v16  ;;  %552 = vmatpush1.bf16.msra.mxu1 %v977_v27 }
  0x84   : > { %553 = vmatprep.subr.bf16.mxu1 %v978_v28 }
  0x86   : > { %854 = vmatpush3.bf16.msra.mxu0 %v957_v19 }
  0x87   : > { %855 = vmatprep.subr.bf16.mxu0 %v958_v20  ;;  %554 = vmatpush1.bf16.msra.mxu1 %v980_v29 }
  0x88   : > { %555 = vmatprep.subr.bf16.mxu1 %v981_v30 }
  0x8a   : > { %856 = vmatpush3.bf16.msra.mxu0 %v959_v23 }
  0x8b   : > { %556 = vmatpush1.bf16.msra.mxu1 %v983_v31 }
  0x8c   : > { %557 = vmatprep.subr.bf16.mxu1 %v984_v32 }
  0x8d   : > { %434 = vmatmul.mubr.bf16.vlgmr.msra.gmra.mrb[0].mxu0 %v960_v25 }
  0x8f   : > { %558 = vmatpush1.bf16.msra.mxu1 %v986_v33 }
 0x160   : > { %v857_v35 = vpop.f32.mrb[0].mxu0 }
 0x161   : > { %v858_v36 = vpop.f32.mrb[1].mxu0 }
 0x162   : > { %v859_v37 = vadd.f32 %v858_v36, %v857_v35  ;;  %v860_v38 = vpop.f32.mrb[2].mxu0 }
 0x163   : > { %v861_v39 = vpop.f32.mrb[3].mxu0 }
 0x164   : > { %v442_v40 = vmax.f32 %v859_v37, 0.0  ;;  %v862_v41 = vadd.f32 %v861_v39, %v860_v38 }
 0x166   : > { %444 = vst [vmem:[%s256_s21] sm:$0xff] %v442_v40  ;;  %v443_v42 = vmax.f32 %v862_v41, 0.0 }
 0x168   : > { %445 = vst [vmem:[%s256_s21 + $0x8] sm:$0xff] %v443_v42  ;;  %v446_v43 = vpack.c.bf16 %v443_v42, %v442_v40 }
 0x16a   : > { %576 = vmatmul.mubr.bf16.vlgmr.msra.gmra.mrb[0].mxu1 %v446_v43 }
 0x16b   : > { %1102 = shalt.err (!%p1099_p2)
}
 0x16c   : > { %s1103_s5 = scalar_lea.hbm %s1436_s6, 256  ;;  %s1107_s24 = scalar_lea.hbm %s1517_s4, 512 }
 0x16d   : > { %p1104_p13 = scmp.ne.s32.totalorder %s1436_s6, %s1103_s5  ;;  %p1108_p4 = scmp.lt.u32.totalorder %s1436_s6, %s1517_s4 }
 0x16e   : > { %p1109_p7 = scmp.lt.u32.totalorder %s1107_s24, %s1103_s5  ;;  %p1111_p11 = scmp.lt.u32.totalorder %s1103_s5, %s1436_s6 }
 0x16f   : > { %p1105_p6 = pnand %p1104_p13, %p1531_p0 }
 0x170   : > { %p1110_p8 = por %p1109_p7, %p1108_p4 }
 0x171   : > { %p1106_p10 = pneg %p1105_p6 }
 0x172   : > { %p1112_p1 = por %p1111_p11, %p1110_p8 }
 0x174   : > { %p1113_p3 = pnand %p1112_p1, %p1106_p10 }
 0x176   : > { %1116 = shalt.err (!%p1113_p3)
}
 0x177   : > { %s1202_s7 = smov 128   ;;  %s1203_s8 = smov 8  }
 0x178   : > { %874 = dma.vmem_to_hbm [thread:$0]  (%p1531_p0), %s1430_s23, 256, %s1436_s6, %s620_s9, %s1202_s7, %s1202_s7, %s1203_s8  }
 0x179   : > { %s787_s23 = sshll.u32 %s1410_s10, 5  ;;  %s839_s30 = sshll.u32 %s1253_s19, 9 }
 0x17a   : > { %s249_s6 = scalar_lea.vmem [#allocation8], %s787_s23  ;;  %s1467_s20 = scalar_lea.hbm %s1516_s3, %s839_s30 }
 0x17b   : > { %s634_s9 = sshll.u32 %s249_s6, 4  ;;  %s615_s19 = scalar_lea.sflag [#allocation4], %s1410_s10  ;;  %s1469_s9 = int_to_ptr.vmem [resolvable:$true] %s634_s9 }
 0x17c   : > { %s1117_s29 = scalar_lea.vmem %s1469_s9, 512  ;;  %s1204_s5 = smov [#allocation8]  }
 0x17d   : > { %p1118_p5 = scmp.ne.s32.totalorder %s1469_s9, %s1117_s29  ;;  %s1121_s12 = sshll.u32 %s1204_s5, 4  ;;  %s1122_s12 = int_to_ptr.vmem [resolvable:$false] %s1121_s12 }
 0x17e   : > { %s1123_s13 = scalar_lea.vmem %s1122_s12, 1024  ;;  %p1124_p2 = scmp.lt.s32.totalorder %s1469_s9, %s1122_s12 }
 0x17f   : > { %p1119_p9 = pnand %p1118_p5, %p1531_p0  ;;  %p1125_p13 = scmp.lt.s32.totalorder %s1123_s13, %s1117_s29 }
 0x181   : > { %p1120_p12 = pneg %p1119_p9  ;;  %p1126_p6 = por %p1125_p13, %p1124_p2 }
 0x183   : > { %p1127_p10 = pnand %p1126_p6, %p1120_p12 }
 0x23d   : > { %v577_v44 = vpop.f32.mrb[0].mxu1 }
 0x23e   : > { %v823_v45 = vmul.f32 -1.442695, %v577_v44  ;;  %v579_v46 = vpop.f32.mrb[1].mxu1 }
 0x23f   : > { %v824_v47 = vmul.f32 -1.442695, %v579_v46  ;;  %v581_v48 = vpop.f32.mrb[2].mxu1 }
 0x240   : > { %987 = vpow2.f32 %v823_v45  ;;  %v825_v49 = vmul.f32 -1.442695, %v581_v48  ;;  %v583_v50 = vpop.f32.mrb[3].mxu1 }
 0x241   : > { %989 = vpow2.f32 %v824_v47  ;;  %v826_v51 = vmul.f32 -1.442695, %v583_v50 }
 0x242   : > { %991 = vpow2.f32 %v825_v49 }
 0x243   : > { %993 = vpow2.f32 %v826_v51 }
 0x24a   : > { %v988_v52 = vpop.eup %987 }
 0x24b   : > { %v990_v53 = vpop.eup %989  ;;  %v598_v54 = vadd.f32 1.0, %v988_v52 }
 0x24c   : > { %v992_v55 = vpop.eup %991  ;;  %v599_v56 = vadd.f32 1.0, %v990_v53 }
 0x24d   : > { %v994_v57 = vpop.eup %993  ;;  %995 = vrcp.f32 %v598_v54  ;;  %v600_v58 = vadd.f32 1.0, %v992_v55 }
 0x24e   : > { %997 = vrcp.f32 %v599_v56  ;;  %v601_v59 = vadd.f32 1.0, %v994_v57 }
 0x24f   : > { %999 = vrcp.f32 %v600_v58 }
 0x250   : > { %1001 = vrcp.f32 %v601_v59 }
 0x257   : > { %v996_v60 = vpop.eup %995 }
 0x258   : > { %v998_v61 = vpop.eup %997  ;;  %610 = vst [vmem:[%s249_s6] sm:$0xff] %v996_v60 }
 0x259   : > { %v1000_v62 = vpop.eup %999  ;;  %611 = vst [vmem:[%s249_s6 + $0x8] sm:$0xff] %v998_v61 }
 0x25a   : > { %v1002_v63 = vpop.eup %1001  ;;  %612 = vst [vmem:[%s249_s6 + $0x10] sm:$0xff] %v1000_v62 }
 0x25b   : > { %613 = vst [vmem:[%s249_s6 + $0x18] sm:$0xff] %v1002_v63 }
 0x25c   : > { %1130 = shalt.err (!%p1127_p10)
}
 0x25d   : > { %s1131_s24 = scalar_lea.hbm %s1467_s20, 512  ;;  %s1135_s7 = scalar_lea.hbm %s1516_s3, 1024 }
 0x25e   : > { %p1132_p4 = scmp.ne.s32.totalorder %s1467_s20, %s1131_s24  ;;  %p1136_p11 = scmp.lt.u32.totalorder %s1467_s20, %s1516_s3 }
 0x25f   : > { %p1137_p1 = scmp.lt.u32.totalorder %s1135_s7, %s1131_s24  ;;  %p1139_p5 = scmp.lt.u32.totalorder %s1131_s24, %s1467_s20 }
 0x260   : > { %p1133_p7 = pnand %p1132_p4, %p1531_p0 }
 0x261   : > { %p1138_p3 = por %p1137_p1, %p1136_p11 }
 0x262   : > { %p1134_p8 = pneg %p1133_p7 }
 0x263   : > { %p1140_p9 = por %p1139_p5, %p1138_p3 }
 0x265   : > { %p1141_p12 = pnand %p1140_p9, %p1134_p8 }
 0x267   : > { %1144 = shalt.err (!%p1141_p12)
}
 0x268   : > { %s1205_s30 = smov 256   ;;  %s1206_s6 = smov 16  }
 0x269   : > { %873 = dma.vmem_to_hbm [thread:$0]  (%p1531_p0), %s1469_s9, 512, %s1467_s20, %s615_s19, %s1205_s30, %s1205_s30, %s1206_s6  }
 0x26a PF: > { %s665_s28 = sand.u32 1, %s1179_s15   ;;  %p1532_p2 = scmp.ne.s32.totalorder %s1522_s22, 0 }
 0x26b   : > { %p1533_p13 = scmp.ge.s32.totalorder %s1191_s18, 2  ;;  %s666_s27 = scalar_lea.sflag [#allocation4], %s665_s28 }
 0x26d   : > { %p889_p6 = pnand %p1533_p13, %p1532_p2 }
 0x26f   : > { %1170 = dma.done.wait (!%p889_p6), %s666_s27, 512  }
 0x270   : > { %1172 = vsyncadd (!%p889_p6), %s666_s27, 4294966784  ;;  %s675_s29 = scalar_lea.sflag [#allocation10], %s665_s28 }
 0x271   : > { %1174 = dma.done.wait (!%p889_p6), %s675_s29, 256  }
 0x272   : > { %1176 = vsyncadd (!%p889_p6), %s675_s29, 4294967040  ;;  %p22_p0 = scmp.ge.s32.totalorder %s1345_s11, 4   ;;  %s1534_s15 = smov %s1183_s16 }
 0x273   : > { %s1535_s16 = smov %s1187_s17  ;;  %s1536_s17 = smov %s1354_s14 }
 0x274   : > { %s1537_s18 = smov %s1345_s11  ;;  %24 = sbr.rel (!%p22_p0) target bundleno = 8 (0x8), region = 102 }
 0x27b   :  { %680 = vsyncpa [#allocation3], 1 }
 0x27c   :  { %682 = vsyncpa [#allocation3 + $0x1], 1 }
 0x27d   :  { %683 = vsyncpa [#allocation6], 1 }
 0x27e   :  { %684 = vsyncpa [#allocation4], 1 }
 0x27f   :  { %686 = vsyncpa [#allocation4 + $0x1], 1 }
 0x280   :  { %687 = vsyncpa [#allocation10], 1 }
 0x281   :  { %689 = vsyncpa [#allocation10 + $0x1], 1 }

</bundles_post_ra>
